<compile_context>
chip_gen: v7x
topology: tpu7x:2x2x1
jax: 0.10.0
libtpu: 0.0.40
codegen_flags: <defaults>
</compile_context>

<pallas_src>
import jax
import jax.numpy as jnp
from jax.experimental import pallas as pl
from jax.experimental.pallas import tpu as pltpu

MEM_SIZE = 512               # frameModel lstm_feats dim (mem_size)
FLOW_FEAT = 512              # flowModel conv_feats dim (resnet34)
NUM_CLASSES = 61
FUSED = FLOW_FEAT + MEM_SIZE  # 1024 == fc2 in_features
LANE = 128
SUBLANE = 8


def _round_up(x, m):
    return (x + m - 1) // m * m


def fusion_classifier_kernel(flow_ref, rgb_ref, wf_ref, wr_ref, b_ref, out_ref):
    """out = flow @ Wf + rgb @ Wr + b  ==  concat([flow, rgb], 1) @ W + b.

    flow/rgb/Wf/Wr are bf16; accumulation and the bias epilogue are f32.
    Dropout (eval mode) is identity.
    """
    acc = jnp.dot(flow_ref[...], wf_ref[...], preferred_element_type=jnp.float32)
    acc = acc + jnp.dot(rgb_ref[...], wr_ref[...], preferred_element_type=jnp.float32)
    out_ref[...] = acc + b_ref[...]


def two_stream_forward(flow_feats, rgb_feats, w, b, *, max_batch_tile=256):
    """flow_feats (B,512), rgb_feats (B,512), w (1024,C) [= fc2.weight.T], b (C,)."""
    B = flow_feats.shape[0]
    C = w.shape[1]

    # Lane-dense class dim: zero-pad to a multiple of 128.
    Cp = _round_up(C, LANE)
    # Batch tile: at least 8 sublanes, at most max_batch_tile rows.
    TB = min(max_batch_tile, _round_up(B, SUBLANE))
    Bp = _round_up(B, TB)

    # bf16 features / weights (MXU operands); f32 bias (VPU epilogue).
    flow_p = jnp.pad(flow_feats, ((0, Bp - B), (0, 0))).astype(jnp.bfloat16)
    rgb_p = jnp.pad(rgb_feats, ((0, Bp - B), (0, 0))).astype(jnp.bfloat16)
    w_p = jnp.pad(w, ((0, 0), (0, Cp - C))).astype(jnp.bfloat16)
    wf = w_p[:FLOW_FEAT, :]          # (512, Cp)
    wr = w_p[FLOW_FEAT:, :]          # (512, Cp)
    b_p = jnp.pad(b, (0, Cp - C)).astype(jnp.float32).reshape(1, Cp)

    grid = (Bp // TB,)

    out_padded = pl.pallas_call(
        fusion_classifier_kernel,
        out_shape=jax.ShapeDtypeStruct((Bp, Cp), jnp.float32),
        grid=grid,
        in_specs=[
            pl.BlockSpec((TB, FLOW_FEAT), lambda i: (i, 0)),   # flow tile
            pl.BlockSpec((TB, MEM_SIZE), lambda i: (i, 0)),    # rgb tile
            pl.BlockSpec((FLOW_FEAT, Cp), lambda i: (0, 0)),   # Wf (resident)
            pl.BlockSpec((MEM_SIZE, Cp), lambda i: (0, 0)),    # Wr (resident)
            pl.BlockSpec((1, Cp), lambda i: (0, 0)),           # bias (resident)
        ],
        out_specs=pl.BlockSpec((TB, Cp), lambda i: (i, 0)),
        compiler_params=pltpu.CompilerParams(
            dimension_semantics=("parallel",),
        ),
    )(flow_p, rgb_p, wf, wr, b_p)

    return out_padded[:B, :C]


if __name__ == "__main__":
    key = jax.random.PRNGKey(0)
    k_flow, k_rgb, k_w, k_b = jax.random.split(key, 4)

    B = 2
    # Stand-ins for the two-stream backbone outputs (see TODO(synk) above).
    flow_feats = jax.random.normal(k_flow, (B, FLOW_FEAT), jnp.float32)
    rgb_feats = jax.random.normal(k_rgb, (B, MEM_SIZE), jnp.float32)

    # fc2 = nn.Linear(512 * 2, num_classes, bias=True); stored transposed (in, out).
    w = jax.random.normal(k_w, (FUSED, NUM_CLASSES), jnp.float32) * 0.02
    bias = jax.random.normal(k_b, (NUM_CLASSES,), jnp.float32) * 0.02

    out = two_stream_forward(flow_feats, rgb_feats, w, bias)
    out = jax.block_until_ready(out)

    # Pure-JAX reference of the module forward (eval mode, f32).
    ref = jnp.concatenate([flow_feats, rgb_feats], axis=1) @ w + bias
    assert out.shape == (B, NUM_CLASSES)
    # bf16 operands with f32 accumulation -> loose-ish tolerance vs f32 ref.
    assert jnp.allclose(out, ref, atol=2e-2, rtol=2e-2), "mismatch vs reference"

    print("KERNEL_OK")
</pallas_src>

<mosaic_0001>
module attributes {stable_mosaic.version = 11 : i64} {
  func.func @fusion_classifier_kernel(%arg0: i32, %arg1: memref<8x512xbf16, #tpu.memory_space<vmem>>, %arg2: memref<8x512xbf16, #tpu.memory_space<vmem>>, %arg3: memref<512x128xbf16, #tpu.memory_space<vmem>>, %arg4: memref<512x128xbf16, #tpu.memory_space<vmem>>, %arg5: memref<1x128xf32, #tpu.memory_space<vmem>>, %arg6: memref<8x128xf32, #tpu.memory_space<vmem>>) attributes {dimension_semantics = [#tpu.dimension_semantics<parallel>], iteration_bounds = array<i64: 1>, scalar_prefetch = 0 : i64, scratch_operands = 0 : i64, tpu.core_type = #tpu.core_type<tc>, window_params = [{transform_indices = @transform_0, window_bounds = array<i64: 8, 512>}, {transform_indices = @transform_1, window_bounds = array<i64: 8, 512>}, {pipeline_mode = #tpu.pipeline_mode<synchronous>, transform_indices = @transform_2, window_bounds = array<i64: 512, 128>}, {pipeline_mode = #tpu.pipeline_mode<synchronous>, transform_indices = @transform_3, window_bounds = array<i64: 512, 128>}, {pipeline_mode = #tpu.pipeline_mode<synchronous>, transform_indices = @transform_4, window_bounds = array<i64: 1, 128>}, {transform_indices = @transform_5, window_bounds = array<i64: 8, 128>}]} {
    %c0 = arith.constant 0 : index
    %c0_0 = arith.constant 0 : index
    %0 = vector.load %arg1[%c0, %c0_0] : memref<8x512xbf16, #tpu.memory_space<vmem>>, vector<8x512xbf16>
    %c0_1 = arith.constant 0 : index
    %c0_2 = arith.constant 0 : index
    %1 = vector.load %arg3[%c0_1, %c0_2] : memref<512x128xbf16, #tpu.memory_space<vmem>>, vector<512x128xbf16>
    %cst = arith.constant dense<0.000000e+00> : vector<8x128xf32>
    %2 = tpu.matmul %0, %1, %cst {dimension_numbers = #tpu.dot_dimension_numbers<[1], [0], [0], [1], [0, 0, 1, 1], [], []>} : vector<8x512xbf16>, vector<512x128xbf16>, vector<8x128xf32> -> vector<8x128xf32>
    %c0_3 = arith.constant 0 : index
    %c0_4 = arith.constant 0 : index
    %3 = vector.load %arg2[%c0_3, %c0_4] : memref<8x512xbf16, #tpu.memory_space<vmem>>, vector<8x512xbf16>
    %c0_5 = arith.constant 0 : index
    %c0_6 = arith.constant 0 : index
    %4 = vector.load %arg4[%c0_5, %c0_6] : memref<512x128xbf16, #tpu.memory_space<vmem>>, vector<512x128xbf16>
    %cst_7 = arith.constant dense<0.000000e+00> : vector<8x128xf32>
    %5 = tpu.matmul %3, %4, %cst_7 {dimension_numbers = #tpu.dot_dimension_numbers<[1], [0], [0], [1], [0, 0, 1, 1], [], []>} : vector<8x512xbf16>, vector<512x128xbf16>, vector<8x128xf32> -> vector<8x128xf32>
    %6 = arith.addf %2, %5 : vector<8x128xf32>
    %c0_8 = arith.constant 0 : index
    %c0_9 = arith.constant 0 : index
    %7 = vector.load %arg5[%c0_8, %c0_9] : memref<1x128xf32, #tpu.memory_space<vmem>>, vector<1x128xf32>
    %8 = vector.broadcast %7 : vector<1x128xf32> to vector<8x128xf32>
    %9 = arith.addf %6, %8 : vector<8x128xf32>
    %c0_10 = arith.constant 0 : index
    %c0_11 = arith.constant 0 : index
    %10 = vector.load %arg6[%c0_10, %c0_11] : memref<8x128xf32, #tpu.memory_space<vmem>>, vector<8x128xf32>
    tpu.vector_store %arg6[%c0_10, %c0_11], %9 {strides = array<i32>} : memref<8x128xf32, #tpu.memory_space<vmem>>, vector<8x128xf32>,
    return
  }
  func.func @transform_0(%arg0: i32) -> (i32, i32) {
    %c0_i32 = arith.constant 0 : i32
    %c0_i32_0 = arith.constant 0 : i32
    return %arg0, %c0_i32 : i32, i32
  }
  func.func @transform_1(%arg0: i32) -> (i32, i32) {
    %c0_i32 = arith.constant 0 : i32
    %c0_i32_0 = arith.constant 0 : i32
    return %arg0, %c0_i32 : i32, i32
  }
  func.func @transform_2(%arg0: i32) -> (i32, i32) {
    %c0_i32 = arith.constant 0 : i32
    %c0_i32_0 = arith.constant 0 : i32
    %c0_i32_1 = arith.constant 0 : i32
    return %c0_i32, %c0_i32_0 : i32, i32
  }
  func.func @transform_3(%arg0: i32) -> (i32, i32) {
    %c0_i32 = arith.constant 0 : i32
    %c0_i32_0 = arith.constant 0 : i32
    %c0_i32_1 = arith.constant 0 : i32
    return %c0_i32, %c0_i32_0 : i32, i32
  }
  func.func @transform_4(%arg0: i32) -> (i32, i32) {
    %c0_i32 = arith.constant 0 : i32
    %c0_i32_0 = arith.constant 0 : i32
    %c0_i32_1 = arith.constant 0 : i32
    return %c0_i32, %c0_i32_0 : i32, i32
  }
  func.func @transform_5(%arg0: i32) -> (i32, i32) {
    %c0_i32 = arith.constant 0 : i32
    %c0_i32_0 = arith.constant 0 : i32
    return %arg0, %c0_i32 : i32, i32
  }
}

</mosaic_0001>

<bundles_post_ra>
// kernel: tpu_custom_call.1
= control target key start
LH: loop header
LB: loop body
LE: loop exit
PB: predicated region body
PF: predicated region fallthrough
CT: control target
= control target key end

     0   :  { %10 = vsyncpa [#allocation3], 0  ;;  %s1261_s0 = inlined_call_operand.hbm [shape: bf16[8,512], index: 0, kind: input, shape index: {}]   ;;  %s1262_s1 = inlined_call_operand.hbm [shape: bf16[8,512], index: 1, kind: input, shape index: {}]   ;;  %s1263_s2 = inlined_call_operand.hbm [shape: bf16[512,128], index: 2, kind: input, shape index: {}]   ;;  %s1264_s3 = inlined_call_operand.hbm [shape: bf16[512,128], index: 3, kind: input, shape index: {}]   ;;  %s1265_s4 = inlined_call_operand.vmem [shape: f32[1,128], index: 4, kind: input, shape index: {}]   ;;  %s1266_s5 = inlined_call_operand.hbm [shape: f32[8,128], index: 5, kind: output, shape index: {}]  }
   0x1   :  { %11 = vsyncpa [#allocation6], 0 }
   0x2   :  { %12 = vsyncpa [#allocation9], 0 }
   0x3   :  { %13 = vsyncpa [#allocation4], 0  ;;  %s1161_s18 = smov [#allocation5]   ;;  %s1162_s20 = smov [#allocation2]  }
   0x4   :  { %s30_s19 = sshll.u32 %s1161_s18, 4  ;;  %s20_s21 = sshll.u32 %s1162_s20, 4  ;;  %s31_s19 = int_to_ptr.vmem [resolvable:$true] %s30_s19  ;;  %s21_s21 = int_to_ptr.vmem [resolvable:$true] %s20_s21 }
   0x5   :  { %s1043_s24 = scalar_lea.hbm %s1262_s1, 256 }
   0x6   :  { %p1044_p0 = scmp.ne.s32.totalorder %s1262_s1, %s1043_s24  ;;  %p1047_p1 = scmp.lt.u32.totalorder %s1043_s24, %s1262_s1 }
   0x8   :  { %p1049_p2 = pnand %p1047_p1, %p1044_p0 }
   0xa   :  { %1052 = shalt.err (!%p1049_p2)
}
   0xb   :  { %s1053_s29 = scalar_lea.vmem %s31_s19, 256  ;;  %p1058_p4 = scmp.lt.s32.totalorder %s31_s19, %s31_s19 }
   0xc   :  { %p1054_p3 = scmp.ne.s32.totalorder %s31_s19, %s1053_s29  ;;  %p1059_p5 = scmp.lt.s32.totalorder %s1053_s29, %s1053_s29 }
   0xe   :  { %p1060_p6 = por %p1059_p5, %p1058_p4 }
  0x10   :  { %p1061_p7 = pnand %p1060_p6, %p1054_p3 }
  0x12   :  { %1064 = shalt.err (!%p1061_p7)
}
  0x13   :  { %33 = dma.hbm_to_vmem [thread:$0]  %s1262_s1, 256, %s31_s19, [#allocation6]  }
  0x14   :  { %s1065_s9 = scalar_lea.hbm %s1261_s0, 256 }
  0x15   :  { %p1066_p8 = scmp.ne.s32.totalorder %s1261_s0, %s1065_s9  ;;  %p1069_p9 = scmp.lt.u32.totalorder %s1065_s9, %s1261_s0 }
  0x17   :  { %p1071_p10 = pnand %p1069_p9, %p1066_p8 }
  0x19   :  { %1074 = shalt.err (!%p1071_p10)
}
  0x1a   :  { %s1075_s14 = scalar_lea.vmem %s21_s21, 256  ;;  %p1080_p12 = scmp.lt.s32.totalorder %s21_s21, %s21_s21 }
  0x1b   :  { %p1076_p11 = scmp.ne.s32.totalorder %s21_s21, %s1075_s14  ;;  %p1081_p13 = scmp.lt.s32.totalorder %s1075_s14, %s1075_s14 }
  0x1d   :  { %p1082_p0 = por %p1081_p13, %p1080_p12 }
  0x1f   :  { %p1083_p1 = pnand %p1082_p0, %p1076_p11 }
  0x21   :  { %1086 = shalt.err (!%p1083_p1)
}
  0x22   :  { %23 = dma.hbm_to_vmem [thread:$0]  %s1261_s0, 256, %s21_s21, [#allocation3]  }
  0x23   :  { %s1163_s16 = smov [#allocation7]   ;;  %s1087_s20 = scalar_lea.hbm %s1263_s2, 4096 }
  0x24   :  { %s39_s17 = sshll.u32 %s1163_s16, 4  ;;  %p1088_p2 = scmp.ne.s32.totalorder %s1263_s2, %s1087_s20  ;;  %s40_s17 = int_to_ptr.vmem [resolvable:$true] %s39_s17 }
  0x25   :  { %p1091_p3 = scmp.lt.u32.totalorder %s1087_s20, %s1263_s2 }
  0x27   :  { %p1093_p4 = pnand %p1091_p3, %p1088_p2 }
  0x29   :  { %1096 = shalt.err (!%p1093_p4)
}
  0x2a   :  { %s1097_s26 = scalar_lea.vmem %s40_s17, 4096  ;;  %p1102_p6 = scmp.lt.s32.totalorder %s40_s17, %s40_s17 }
  0x2b   :  { %p1098_p5 = scmp.ne.s32.totalorder %s40_s17, %s1097_s26  ;;  %p1103_p7 = scmp.lt.s32.totalorder %s1097_s26, %s1097_s26 }
  0x2d   :  { %p1104_p8 = por %p1103_p7, %p1102_p6 }
  0x2f   :  { %p1105_p9 = pnand %p1104_p8, %p1098_p5 }
  0x31   :  { %1108 = shalt.err (!%p1105_p9)
}
  0x32   :  { %s1164_s0 = smov 64   ;;  %s1165_s21 = smov 4  }
  0x33   :  { %45 = dma.hbm_to_vmem [thread:$0]  %s1263_s2, 4096, %s40_s17, [#allocation6], %s1164_s0, %s1164_s0, %s1165_s21  }
  0x34   :  { %s1166_s29 = smov [#allocation8]   ;;  %s1109_s8 = scalar_lea.hbm %s1264_s3, 4096 }
  0x35   :  { %s51_s30 = sshll.u32 %s1166_s29, 4  ;;  %p1110_p10 = scmp.ne.s32.totalorder %s1264_s3, %s1109_s8  ;;  %s52_s30 = int_to_ptr.vmem [resolvable:$true] %s51_s30 }
  0x36   :  { %p1113_p11 = scmp.lt.u32.totalorder %s1109_s8, %s1264_s3 }
  0x38   :  { %p1115_p12 = pnand %p1113_p11, %p1110_p10 }
  0x3a   :  { %1118 = shalt.err (!%p1115_p12)
}
  0x3b   :  { %s1119_s13 = scalar_lea.vmem %s52_s30, 4096  ;;  %p1124_p0 = scmp.lt.s32.totalorder %s52_s30, %s52_s30 }
  0x3c   :  { %p1120_p13 = scmp.ne.s32.totalorder %s52_s30, %s1119_s13  ;;  %p1125_p1 = scmp.lt.s32.totalorder %s1119_s13, %s1119_s13 }
  0x3e   :  { %p1126_p2 = por %p1125_p1, %p1124_p0 }
  0x40   :  { %p1127_p3 = pnand %p1126_p2, %p1120_p13 }
  0x42   :  { %1130 = shalt.err (!%p1127_p3)
}
  0x43   :  { %57 = dma.hbm_to_vmem [thread:$0]  %s1264_s3, 4096, %s52_s30, [#allocation9], %s1164_s0, %s1164_s0, %s1165_s21  }
  0x44   :  { %1153 = dma.done.wait [#allocation3], 256  }
  0x45   :  { %1154 = vsyncadd [#allocation3], 4294967040 }
  0x46   :  { %1155 = dma.done.wait [#allocation6], 4352  }
  0x47   :  { %1156 = vsyncadd [#allocation6], 4294962944 }
  0x48   :  { %1157 = dma.done.wait [#allocation9], 4096  }
  0x49   :  { %1158 = vsyncadd [#allocation9], 4294963200  ;;  %v971_v0 = vld [vmem:[#allocation8 + $0x40] sm:$0xff]   ;;  %v975_v4 = vld [vmem:[#allocation8 + $0x48] sm:$0xff]   ;;  %s1167_s15 = smov [#allocation10]  }
  0x4a   :  { %v972_v1 = vld [vmem:[#allocation8 + $0xc0] sm:$0xff]   ;;  %876 = vmatprep.subr.bf16.mxu0 %v971_v0  ;;  %v976_v5 = vld [vmem:[#allocation8 + $0xc8] sm:$0xff]   ;;  %v979_v8 = vld [vmem:[#allocation8 + $0x50] sm:$0xff]   ;;  %s792_s16 = sshll.u32 %s1167_s15, 4  ;;  %s793_s16 = int_to_ptr.vmem [resolvable:$true] %s792_s16 }
  0x4b   :  { %v973_v2 = vld [vmem:[#allocation8] sm:$0xff]   ;;  %898 = vmatprep.subr.bf16.mxu1 %v972_v1  ;;  %v977_v6 = vld [vmem:[#allocation8 + $0x8] sm:$0xff]   ;;  %v980_v9 = vld [vmem:[#allocation8 + $0xd0] sm:$0xff]   ;;  %s1131_s17 = scalar_lea.vmem %s793_s16, 128  ;;  %p1136_p5 = scmp.lt.s32.totalorder %s793_s16, %s793_s16 }
  0x4c   :  { %v974_v3 = vld [vmem:[#allocation8 + $0x80] sm:$0xff]   ;;  %877 = vmatpush3.bf16.msra.mxu0 %v973_v2  ;;  %v978_v7 = vld [vmem:[#allocation8 + $0x88] sm:$0xff]   ;;  %v981_v10 = vld [vmem:[#allocation8 + $0x10] sm:$0xff]   ;;  %p1132_p4 = scmp.ne.s32.totalorder %s793_s16, %s1131_s17  ;;  %p1137_p6 = scmp.lt.s32.totalorder %s1131_s17, %s1131_s17 }
  0x4d   :  { %899 = vmatpush3.bf16.msra.mxu1 %v974_v3  ;;  %878 = vmatprep.subr.bf16.mxu0 %v975_v4  ;;  %v982_v11 = vld [vmem:[#allocation8 + $0x90] sm:$0xff]   ;;  %v983_v12 = vld [vmem:[#allocation8 + $0x58] sm:$0xff]   ;;  %v987_v16 = vld [vmem:[#allocation8 + $0x60] sm:$0xff]  }
  0x4e   :  { %900 = vmatprep.subr.bf16.mxu1 %v976_v5  ;;  %v984_v13 = vld [vmem:[#allocation8 + $0xd8] sm:$0xff]   ;;  %v988_v17 = vld [vmem:[#allocation8 + $0xe0] sm:$0xff]   ;;  %v991_v20 = vld [vmem:[#allocation8 + $0x68] sm:$0xff]   ;;  %p1138_p7 = por %p1137_p6, %p1136_p5 }
  0x4f   :  { %v985_v14 = vld [vmem:[#allocation8 + $0x18] sm:$0xff]   ;;  %v989_v18 = vld [vmem:[#allocation8 + $0x20] sm:$0xff]   ;;  %v992_v21 = vld [vmem:[#allocation8 + $0xe8] sm:$0xff]  }
  0x50   :  { %879 = vmatpush3.bf16.msra.mxu0 %v977_v6  ;;  %v986_v15 = vld [vmem:[#allocation8 + $0x98] sm:$0xff]   ;;  %v990_v19 = vld [vmem:[#allocation8 + $0xa0] sm:$0xff]   ;;  %v993_v22 = vld [vmem:[#allocation8 + $0x28] sm:$0xff]   ;;  %p1139_p8 = pnand %p1138_p7, %p1132_p4 }
  0x51   :  { %901 = vmatpush3.bf16.msra.mxu1 %v978_v7  ;;  %880 = vmatprep.subr.bf16.mxu0 %v979_v8  ;;  %v994_v23 = vld [vmem:[#allocation8 + $0xa8] sm:$0xff]   ;;  %v995_v24 = vld [vmem:[#allocation8 + $0x70] sm:$0xff]   ;;  %v999_v28 = vld [vmem:[#allocation8 + $0x78] sm:$0xff]  }
  0x52   :  { %902 = vmatprep.subr.bf16.mxu1 %v980_v9  ;;  %v996_v25 = vld [vmem:[#allocation8 + $0xf0] sm:$0xff]   ;;  %v1000_v29 = vld [vmem:[#allocation8 + $0xf8] sm:$0xff]   ;;  %v1007_v38 = vld [vmem:[#allocation7 + $0x40] sm:$0xff]  }
  0x53   :  { %v997_v26 = vld [vmem:[#allocation8 + $0x30] sm:$0xff]   ;;  %v1001_v30 = vld [vmem:[#allocation8 + $0x38] sm:$0xff]   ;;  %v1008_v39 = vld [vmem:[#allocation7 + $0xc0] sm:$0xff]  }
  0x54   :  { %881 = vmatpush3.bf16.msra.mxu0 %v981_v10  ;;  %v998_v27 = vld [vmem:[#allocation8 + $0xb0] sm:$0xff]   ;;  %v1002_v31 = vld [vmem:[#allocation8 + $0xb8] sm:$0xff]   ;;  %v1009_v40 = vld [vmem:[#allocation7] sm:$0xff]  }
  0x55   :  { %903 = vmatpush3.bf16.msra.mxu1 %v982_v11  ;;  %882 = vmatprep.subr.bf16.mxu0 %v983_v12  ;;  %v139_v32 = vld [vmem:[#allocation5] sm:$0xff]  ;;  %v140_v33 = vld [vmem:[#allocation5 + $0x8] sm:$0xff]  ;;  %v1010_v41 = vld [vmem:[#allocation7 + $0x80] sm:$0xff]  }
  0x56   :  { %904 = vmatprep.subr.bf16.mxu1 %v984_v13  ;;  %v803_v34 = vcombine.low %v139_v32, %v139_v32  ;;  %v804_v35 = vcombine.high %v139_v32, %v139_v32  ;;  %v805_v36 = vcombine.low %v140_v33, %v140_v33  ;;  %v806_v37 = vcombine.high %v140_v33, %v140_v33  ;;  %v1011_v42 = vld [vmem:[#allocation7 + $0x48] sm:$0xff]   ;;  %v1015_v46 = vld [vmem:[#allocation7 + $0x50] sm:$0xff]   ;;  %v1019_v50 = vld [vmem:[#allocation7 + $0x58] sm:$0xff]  }
  0x57   :  { %v1012_v43 = vld [vmem:[#allocation7 + $0xc8] sm:$0xff]   ;;  %v1016_v47 = vld [vmem:[#allocation7 + $0xd0] sm:$0xff]   ;;  %v1020_v51 = vld [vmem:[#allocation7 + $0xd8] sm:$0xff]  }
  0x58   :  { %883 = vmatpush3.bf16.msra.mxu0 %v985_v14  ;;  %443 = vmatprep.mubr.bf16.mxu0 %v804_v35  ;;  %v1013_v44 = vld [vmem:[#allocation7 + $0x8] sm:$0xff]   ;;  %v1017_v48 = vld [vmem:[#allocation7 + $0x10] sm:$0xff]   ;;  %v1021_v52 = vld [vmem:[#allocation7 + $0x18] sm:$0xff]  }
  0x59   :  { %905 = vmatpush3.bf16.msra.mxu1 %v986_v15  ;;  %884 = vmatprep.subr.bf16.mxu0 %v987_v16  ;;  %v1014_v45 = vld [vmem:[#allocation7 + $0x88] sm:$0xff]   ;;  %v1018_v49 = vld [vmem:[#allocation7 + $0x90] sm:$0xff]   ;;  %v1022_v53 = vld [vmem:[#allocation7 + $0x98] sm:$0xff]  }
  0x5a   :  { %906 = vmatprep.subr.bf16.mxu1 %v988_v17  ;;  %483 = vmatprep.mubr.bf16.mxu1 %v806_v37  ;;  %v1023_v54 = vld [vmem:[#allocation7 + $0x60] sm:$0xff]   ;;  %v1027_v58 = vld [vmem:[#allocation7 + $0x68] sm:$0xff]   ;;  %v1031_v62 = vld [vmem:[#allocation7 + $0x70] sm:$0xff]  }
  0x5b   :  { %v1024_v55 = vld [vmem:[#allocation7 + $0xe0] sm:$0xff]   ;;  %v1028_v59 = vld [vmem:[#allocation7 + $0xe8] sm:$0xff]   ;;  %v1032_v63 = vld [vmem:[#allocation7 + $0xf0] sm:$0xff]  }
  0x5c   :  { %885 = vmatpush3.bf16.msra.mxu0 %v989_v18  ;;  %v1025_v56 = vld [vmem:[#allocation7 + $0x20] sm:$0xff]   ;;  %v1029_v60 = vld [vmem:[#allocation7 + $0x28] sm:$0xff]   ;;  %v1033_v0 = vld [vmem:[#allocation7 + $0x30] sm:$0xff]  }
  0x5d   :  { %907 = vmatpush3.bf16.msra.mxu1 %v990_v19  ;;  %886 = vmatprep.subr.bf16.mxu0 %v991_v20  ;;  %v1026_v57 = vld [vmem:[#allocation7 + $0xa0] sm:$0xff]   ;;  %v1030_v61 = vld [vmem:[#allocation7 + $0xa8] sm:$0xff]   ;;  %v1034_v1 = vld [vmem:[#allocation7 + $0xb0] sm:$0xff]  }
  0x5e   :  { %908 = vmatprep.subr.bf16.mxu1 %v992_v21  ;;  %v1035_v2 = vld [vmem:[#allocation7 + $0x78] sm:$0xff]   ;;  %v73_v6 = vld [vmem:[#allocation2] sm:$0xff]  ;;  %v74_v9 = vld [vmem:[#allocation2 + $0x8] sm:$0xff] }
  0x5f   :  { %v1036_v3 = vld [vmem:[#allocation7 + $0xf8] sm:$0xff]   ;;  %v839_v7 = vcombine.low %v73_v6, %v73_v6  ;;  %v840_v8 = vcombine.high %v73_v6, %v73_v6  ;;  %v841_v10 = vcombine.low %v74_v9, %v74_v9  ;;  %v842_v11 = vcombine.high %v74_v9, %v74_v9 }
  0x60   :  { %887 = vmatpush3.bf16.msra.mxu0 %v993_v22  ;;  %v1037_v4 = vld [vmem:[#allocation7 + $0x38] sm:$0xff]  }
  0x61   :  { %909 = vmatpush3.bf16.msra.mxu1 %v994_v23  ;;  %888 = vmatprep.subr.bf16.mxu0 %v995_v24  ;;  %v1038_v5 = vld [vmem:[#allocation7 + $0xb8] sm:$0xff]  }
  0x62   :  { %910 = vmatprep.subr.bf16.mxu1 %v996_v25 }
  0x64   :  { %889 = vmatpush3.bf16.msra.mxu0 %v997_v26 }
  0x65   :  { %911 = vmatpush3.bf16.msra.mxu1 %v998_v27  ;;  %890 = vmatprep.subr.bf16.mxu0 %v999_v28 }
  0x66   :  { %912 = vmatprep.subr.bf16.mxu1 %v1000_v29 }
  0x68   :  { %891 = vmatpush3.bf16.msra.mxu0 %v1001_v30 }
  0x69   :  { %913 = vmatpush3.bf16.msra.mxu1 %v1002_v31  ;;  %920 = vmatprep.subr.bf16.mxu0 %v1007_v38 }
  0x6a   :  { %942 = vmatprep.subr.bf16.mxu1 %v1008_v39 }
  0x6b   :  { %444 = vmatmul.mubr.bf16.vlgmr.msra.gmra.mrb[0].mxu0 %v803_v34  ;;  %v875_v34 = vld [vmem:[%s1265_s4] ss:$0 sm:$0xff] }
  0x6c   :  { %484 = vmatmul.mubr.bf16.vlgmr.msra.gmra.mrb[0].mxu1 %v805_v36  ;;  %921 = vmatpush3.bf16.msra.mxu0 %v1009_v40 }
  0x6d   :  { %943 = vmatpush3.bf16.msra.mxu1 %v1010_v41  ;;  %922 = vmatprep.subr.bf16.mxu0 %v1011_v42 }
  0x6e   :  { %944 = vmatprep.subr.bf16.mxu1 %v1012_v43  ;;  %729 = vmatprep.mubr.bf16.mxu0 %v840_v8 }
  0x6f   :  { %769 = vmatprep.mubr.bf16.mxu1 %v842_v11 }
  0x70   :  { %923 = vmatpush3.bf16.msra.mxu0 %v1013_v44 }
  0x71   :  { %945 = vmatpush3.bf16.msra.mxu1 %v1014_v45  ;;  %924 = vmatprep.subr.bf16.mxu0 %v1015_v46 }
  0x72   :  { %946 = vmatprep.subr.bf16.mxu1 %v1016_v47 }
  0x74   :  { %925 = vmatpush3.bf16.msra.mxu0 %v1017_v48 }
  0x75   :  { %947 = vmatpush3.bf16.msra.mxu1 %v1018_v49  ;;  %926 = vmatprep.subr.bf16.mxu0 %v1019_v50 }
  0x76   :  { %948 = vmatprep.subr.bf16.mxu1 %v1020_v51 }
  0x78   :  { %927 = vmatpush3.bf16.msra.mxu0 %v1021_v52 }
  0x79   :  { %949 = vmatpush3.bf16.msra.mxu1 %v1022_v53  ;;  %928 = vmatprep.subr.bf16.mxu0 %v1023_v54 }
  0x7a   :  { %950 = vmatprep.subr.bf16.mxu1 %v1024_v55 }
  0x7c   :  { %929 = vmatpush3.bf16.msra.mxu0 %v1025_v56 }
  0x7d   :  { %951 = vmatpush3.bf16.msra.mxu1 %v1026_v57  ;;  %930 = vmatprep.subr.bf16.mxu0 %v1027_v58 }
  0x7e   :  { %952 = vmatprep.subr.bf16.mxu1 %v1028_v59 }
  0x80   :  { %931 = vmatpush3.bf16.msra.mxu0 %v1029_v60 }
  0x81   :  { %953 = vmatpush3.bf16.msra.mxu1 %v1030_v61  ;;  %932 = vmatprep.subr.bf16.mxu0 %v1031_v62 }
  0x82   :  { %954 = vmatprep.subr.bf16.mxu1 %v1032_v63 }
  0x84   :  { %933 = vmatpush3.bf16.msra.mxu0 %v1033_v0 }
  0x85   :  { %955 = vmatpush3.bf16.msra.mxu1 %v1034_v1  ;;  %934 = vmatprep.subr.bf16.mxu0 %v1035_v2 }
  0x86   :  { %956 = vmatprep.subr.bf16.mxu1 %v1036_v3 }
  0x88   :  { %935 = vmatpush3.bf16.msra.mxu0 %v1037_v4 }
  0x89   :  { %957 = vmatpush3.bf16.msra.mxu1 %v1038_v5 }
  0x8b   :  { %730 = vmatmul.mubr.bf16.vlgmr.msra.gmra.mrb[4].mxu0 %v839_v7 }
  0x8c   :  { %770 = vmatmul.mubr.bf16.vlgmr.msra.gmra.mrb[4].mxu1 %v841_v10 }
 0x13e   :  { %v892_v12 = vpop.f32.mrb[0].mxu0 }
 0x13f   :  { %v914_v13 = vpop.f32.mrb[0].mxu1  ;;  %v893_v14 = vpop.f32.mrb[1].mxu0 }
 0x140   :  { %v915_v15 = vpop.f32.mrb[1].mxu1  ;;  %v894_v16 = vadd.f32 %v893_v14, %v892_v12  ;;  %v895_v18 = vpop.f32.mrb[2].mxu0 }
 0x141   :  { %v916_v17 = vadd.f32 %v915_v15, %v914_v13  ;;  %v917_v19 = vpop.f32.mrb[2].mxu1  ;;  %v896_v20 = vpop.f32.mrb[3].mxu0 }
 0x142   :  { %v918_v21 = vpop.f32.mrb[3].mxu1 }
 0x143   :  { %v486_v22 = vadd.f32 %v916_v17, %v894_v16 }
 0x15e   :  { %v936_v23 = vpop.f32.mrb[4].mxu0 }
 0x15f   :  { %v958_v24 = vpop.f32.mrb[4].mxu1  ;;  %v937_v25 = vpop.f32.mrb[5].mxu0 }
 0x160   :  { %v959_v26 = vpop.f32.mrb[5].mxu1  ;;  %v938_v27 = vadd.f32 %v937_v25, %v936_v23  ;;  %v939_v29 = vpop.f32.mrb[6].mxu0 }
 0x161   :  { %v960_v28 = vadd.f32 %v959_v26, %v958_v24  ;;  %v961_v30 = vpop.f32.mrb[6].mxu1  ;;  %v940_v31 = vpop.f32.mrb[7].mxu0 }
 0x162   :  { %v962_v32 = vpop.f32.mrb[7].mxu1  ;;  %v732_v33 = vadd.f32 %v938_v27, %v486_v22 }
 0x164   :  { %v772_v35 = vadd.f32 %v960_v28, %v732_v33 }
 0x166   :  { %v784_v36 = vadd.f32 %v875_v34, %v772_v35 }
 0x168   :  { %785 = vst [vmem:[#allocation10] sm:$0xff] %v784_v36 }
 0x169   :  { %1142 = shalt.err (!%p1139_p8)
}
 0x16a   :  { %s1143_s20 = scalar_lea.hbm %s1266_s5, 128 }
 0x16b   :  { %p1144_p9 = scmp.ne.s32.totalorder %s1266_s5, %s1143_s20  ;;  %p1147_p10 = scmp.lt.u32.totalorder %s1143_s20, %s1266_s5 }
 0x16d   :  { %p1149_p11 = pnand %p1147_p10, %p1144_p9 }
 0x16f   :  { %1152 = shalt.err (!%p1149_p11)
}
 0x170   :  { %795 = dma.vmem_to_hbm [thread:$0]  %s793_s16, 128, %s1266_s5, [#allocation4]  }
 0x171   :  { %1159 = dma.done.wait [#allocation4], 128  }
 0x172   :  { %1160 = vsyncadd [#allocation4], 4294967168 }
 0x173   :  { %799 = vsyncpa [#allocation3], 1 }
 0x174   :  { %800 = vsyncpa [#allocation6], 1 }
 0x175   :  { %801 = vsyncpa [#allocation9], 1 }
 0x176   :  { %802 = vsyncpa [#allocation4], 1 }

</bundles_post_ra>
